<compile_context>
chip_gen: v6e
topology: v6e:2x2x1
jax: 0.10.0
libtpu: 0.0.40
codegen_flags: <defaults>
</compile_context>

<pallas_src>
import jax
import jax.numpy as jnp
from jax.experimental import pallas as pl
from jax.experimental.pallas import tpu as pltpu

H1 = 128
H2 = 256
LANE = 128
SUBLANE = 8


def _round_up(n, m):
    return ((n + m - 1) // m) * m


def generator_kernel(x_ref, w1_ref, b1_ref, w2_ref, b2_ref, w3_ref, b3_ref,
                     o_ref):
    # fc1 + relu  (bf16 operands, f32 accumulate)
    h1 = jnp.dot(x_ref[...], w1_ref[...],
                 preferred_element_type=jnp.float32) + b1_ref[...]
    h1 = jnp.maximum(h1, 0.0).astype(jnp.bfloat16)
    # fc2 + relu
    h2 = jnp.dot(h1, w2_ref[...],
                 preferred_element_type=jnp.float32) + b2_ref[...]
    h2 = jnp.maximum(h2, 0.0).astype(jnp.bfloat16)
    # fc3 + tanh (tanh runs on the EUP; keep it in f32 then cast to out dtype)
    h3 = jnp.dot(h2, w3_ref[...],
                 preferred_element_type=jnp.float32) + b3_ref[...]
    o_ref[...] = jnp.tanh(h3).astype(o_ref.dtype)


def generator_forward(x, params, *, tile_b=256):
    """x: (B, input_size) float32. params: dict of w1,b1,w2,b2,w3,b3 (f32).

    Pads feature dims to multiples of 128 (lane-dense stores), pads batch to
    a multiple of the batch tile, casts matmul operands to bf16, and slices
    the f32 result back to (B, output_size).
    """
    B, in_dim = x.shape
    out_dim = params["w3"].shape[1]

    in_pad = _round_up(in_dim, LANE)
    out_pad = _round_up(out_dim, LANE)

    # Effective batch tile: multiple of 8 sublanes, no larger than padded B.
    # For large B, sweep tile_b in {256, 512, 1024}; keep grid >= 2 so the
    # "parallel" axis can shard across both TensorCores on v7x.
    tile_b = _round_up(max(tile_b, SUBLANE), SUBLANE)
    b_min = _round_up(B, SUBLANE)
    tile_b_eff = min(tile_b, b_min)
    B_pad = _round_up(B, tile_b_eff)

    # Zero-pad + cast operands (zero pad rows/cols contribute nothing).
    xp = jnp.pad(x, ((0, B_pad - B), (0, in_pad - in_dim))).astype(jnp.bfloat16)
    w1 = jnp.pad(params["w1"], ((0, in_pad - in_dim), (0, 0))).astype(jnp.bfloat16)
    w2 = params["w2"].astype(jnp.bfloat16)
    w3 = jnp.pad(params["w3"], ((0, 0), (0, out_pad - out_dim))).astype(jnp.bfloat16)
    b1 = params["b1"].astype(jnp.float32)
    b2 = params["b2"].astype(jnp.float32)
    b3 = jnp.pad(params["b3"], ((0, 0), (0, out_pad - out_dim))).astype(jnp.float32)

    grid = (B_pad // tile_b_eff,)

    # Batch tiled over the grid; weights/biases are small and stay resident
    # (constant block index -> Pallas does not re-fetch them per step).
    # If the x-tile DMA is exposed at large tile_b, add
    # pipeline_mode=pl.Buffered(3) to in_specs[0] only.
    in_specs = [
        pl.BlockSpec((tile_b_eff, in_pad), lambda i: (i, 0)),   # x tile
        pl.BlockSpec((in_pad, H1), lambda i: (0, 0)),           # w1
        pl.BlockSpec((1, H1), lambda i: (0, 0)),                # b1
        pl.BlockSpec((H1, H2), lambda i: (0, 0)),               # w2
        pl.BlockSpec((1, H2), lambda i: (0, 0)),                # b2
        pl.BlockSpec((H2, out_pad), lambda i: (0, 0)),          # w3
        pl.BlockSpec((1, out_pad), lambda i: (0, 0)),           # b3
    ]
    out_specs = pl.BlockSpec((tile_b_eff, out_pad), lambda i: (i, 0))

    flops = 2 * B_pad * (in_pad * H1 + H1 * H2 + H2 * out_pad)
    bytes_accessed = (
        xp.size * 2 + w1.size * 2 + w2.size * 2 + w3.size * 2
        + (b1.size + b2.size + b3.size) * 4 + B_pad * out_pad * 4)

    out = pl.pallas_call(
        generator_kernel,
        out_shape=jax.ShapeDtypeStruct((B_pad, out_pad), jnp.float32),
        grid_spec=pl.GridSpec(
            grid=grid,
            in_specs=in_specs,
            out_specs=out_specs,
        ),
        compiler_params=pltpu.CompilerParams(
            dimension_semantics=("parallel",)),
        cost_estimate=pl.CostEstimate(
            flops=flops,
            transcendentals=B_pad * out_pad,
            bytes_accessed=bytes_accessed),
    )(xp, w1, b1, w2, b2, w3, b3)

    return out[:B, :out_dim]


def init_params(key, input_size, output_size):
    """Deterministic init mimicking torch.nn.Linear's uniform(-1/sqrt(fan_in))."""
    ks = jax.random.split(key, 6)

    def lin(kw, kb, fan_in, fan_out):
        bound = 1.0 / jnp.sqrt(fan_in)
        w = jax.random.uniform(kw, (fan_in, fan_out), jnp.float32,
                               -bound, bound)
        b = jax.random.uniform(kb, (1, fan_out), jnp.float32, -bound, bound)
        return w, b

    w1, b1 = lin(ks[0], ks[1], input_size, H1)
    w2, b2 = lin(ks[2], ks[3], H1, H2)
    w3, b3 = lin(ks[4], ks[5], H2, output_size)
    return dict(w1=w1, b1=b1, w2=w2, b2=b2, w3=w3, b3=b3)


def generator_ref(x, p):
    h1 = jnp.maximum(x @ p["w1"] + p["b1"], 0.0)
    h2 = jnp.maximum(h1 @ p["w2"] + p["b2"], 0.0)
    return jnp.tanh(h2 @ p["w3"] + p["b3"])


if __name__ == "__main__":
    # Synthetic stand-in for 3*(num_vertices + num_faces) from the .obj mesh.
    # TODO(synk): real input_size comes from an Open3D mesh load; use a small
    # synthetic value here.
    input_size = 48
    output_size = 48
    batch = 8

    key = jax.random.PRNGKey(0)
    kx, kp = jax.random.split(key)
    x = jax.random.normal(kx, (batch, input_size), jnp.float32)
    params = init_params(kp, input_size, output_size)

    fwd = jax.jit(generator_forward)             # fuse pad/cast around the kernel
    out = fwd(x, params)                         # tile_b defaults to 256, clamps to B
    out = jax.block_until_ready(out)

    ref = generator_ref(x, params)               # f32 reference
    assert out.shape == (batch, output_size)
    # bf16 matmul operands (f32 accumulate) -> loosen tolerance vs f32 ref.
    assert jnp.allclose(out, ref, atol=3e-2, rtol=3e-2), "mismatch vs reference"

    print("KERNEL_OK")
</pallas_src>

<mosaic_0001>
module attributes {stable_mosaic.version = 11 : i64} {
  func.func @generator_kernel(%arg0: i32, %arg1: memref<8x128xbf16, #tpu.memory_space<vmem>>, %arg2: memref<128x128xbf16, #tpu.memory_space<vmem>>, %arg3: memref<1x128xf32, #tpu.memory_space<vmem>>, %arg4: memref<128x256xbf16, #tpu.memory_space<vmem>>, %arg5: memref<1x256xf32, #tpu.memory_space<vmem>>, %arg6: memref<256x128xbf16, #tpu.memory_space<vmem>>, %arg7: memref<1x128xf32, #tpu.memory_space<vmem>>, %arg8: memref<8x128xf32, #tpu.memory_space<vmem>>) attributes {dimension_semantics = [#tpu.dimension_semantics<parallel>], iteration_bounds = array<i64: 1>, scalar_prefetch = 0 : i64, scratch_operands = 0 : i64, tpu.core_type = #tpu.core_type<tc>, window_params = [{transform_indices = @transform_0, window_bounds = array<i64: 8, 128>}, {pipeline_mode = #tpu.pipeline_mode<synchronous>, transform_indices = @transform_1, window_bounds = array<i64: 128, 128>}, {pipeline_mode = #tpu.pipeline_mode<synchronous>, transform_indices = @transform_2, window_bounds = array<i64: 1, 128>}, {pipeline_mode = #tpu.pipeline_mode<synchronous>, transform_indices = @transform_3, window_bounds = array<i64: 128, 256>}, {pipeline_mode = #tpu.pipeline_mode<synchronous>, transform_indices = @transform_4, window_bounds = array<i64: 1, 256>}, {pipeline_mode = #tpu.pipeline_mode<synchronous>, transform_indices = @transform_5, window_bounds = array<i64: 256, 128>}, {pipeline_mode = #tpu.pipeline_mode<synchronous>, transform_indices = @transform_6, window_bounds = array<i64: 1, 128>}, {transform_indices = @transform_7, window_bounds = array<i64: 8, 128>}]} {
    %c0 = arith.constant 0 : index
    %c0_0 = arith.constant 0 : index
    %0 = vector.load %arg1[%c0, %c0_0] : memref<8x128xbf16, #tpu.memory_space<vmem>>, vector<8x128xbf16>
    %c0_1 = arith.constant 0 : index
    %c0_2 = arith.constant 0 : index
    %1 = vector.load %arg2[%c0_1, %c0_2] : memref<128x128xbf16, #tpu.memory_space<vmem>>, vector<128x128xbf16>
    %cst = arith.constant dense<0.000000e+00> : vector<8x128xf32>
    %2 = tpu.matmul %0, %1, %cst {dimension_numbers = #tpu.dot_dimension_numbers<[1], [0], [0], [1], [0, 0, 1, 1], [], []>} : vector<8x128xbf16>, vector<128x128xbf16>, vector<8x128xf32> -> vector<8x128xf32>
    %c0_3 = arith.constant 0 : index
    %c0_4 = arith.constant 0 : index
    %3 = vector.load %arg3[%c0_3, %c0_4] : memref<1x128xf32, #tpu.memory_space<vmem>>, vector<1x128xf32>
    %4 = vector.broadcast %3 : vector<1x128xf32> to vector<8x128xf32>
    %5 = arith.addf %2, %4 : vector<8x128xf32>
    %cst_5 = arith.constant 0.000000e+00 : f32
    %6 = vector.broadcast %cst_5 : f32 to vector<8x128xf32>
    %7 = arith.maximumf %5, %6 : vector<8x128xf32>
    %8 = arith.truncf %7 : vector<8x128xf32> to vector<8x128xbf16>
    %c0_6 = arith.constant 0 : index
    %c0_7 = arith.constant 0 : index
    %9 = vector.load %arg4[%c0_6, %c0_7] : memref<128x256xbf16, #tpu.memory_space<vmem>>, vector<128x256xbf16>
    %cst_8 = arith.constant dense<0.000000e+00> : vector<8x256xf32>
    %10 = tpu.matmul %8, %9, %cst_8 {dimension_numbers = #tpu.dot_dimension_numbers<[1], [0], [0], [1], [0, 0, 1, 1], [], []>} : vector<8x128xbf16>, vector<128x256xbf16>, vector<8x256xf32> -> vector<8x256xf32>
    %c0_9 = arith.constant 0 : index
    %c0_10 = arith.constant 0 : index
    %11 = vector.load %arg5[%c0_9, %c0_10] : memref<1x256xf32, #tpu.memory_space<vmem>>, vector<1x256xf32>
    %12 = vector.broadcast %11 : vector<1x256xf32> to vector<8x256xf32>
    %13 = arith.addf %10, %12 : vector<8x256xf32>
    %cst_11 = arith.constant 0.000000e+00 : f32
    %14 = vector.broadcast %cst_11 : f32 to vector<8x256xf32>
    %15 = arith.maximumf %13, %14 : vector<8x256xf32>
    %16 = arith.truncf %15 : vector<8x256xf32> to vector<8x256xbf16>
    %c0_12 = arith.constant 0 : index
    %c0_13 = arith.constant 0 : index
    %17 = vector.load %arg6[%c0_12, %c0_13] : memref<256x128xbf16, #tpu.memory_space<vmem>>, vector<256x128xbf16>
    %cst_14 = arith.constant dense<0.000000e+00> : vector<8x128xf32>
    %18 = tpu.matmul %16, %17, %cst_14 {dimension_numbers = #tpu.dot_dimension_numbers<[1], [0], [0], [1], [0, 0, 1, 1], [], []>} : vector<8x256xbf16>, vector<256x128xbf16>, vector<8x128xf32> -> vector<8x128xf32>
    %c0_15 = arith.constant 0 : index
    %c0_16 = arith.constant 0 : index
    %19 = vector.load %arg7[%c0_15, %c0_16] : memref<1x128xf32, #tpu.memory_space<vmem>>, vector<1x128xf32>
    %20 = vector.broadcast %19 : vector<1x128xf32> to vector<8x128xf32>
    %21 = arith.addf %18, %20 : vector<8x128xf32>
    %22 = math.tanh %21 : vector<8x128xf32>
    %c0_17 = arith.constant 0 : index
    %c0_18 = arith.constant 0 : index
    %23 = vector.load %arg8[%c0_17, %c0_18] : memref<8x128xf32, #tpu.memory_space<vmem>>, vector<8x128xf32>
    tpu.vector_store %arg8[%c0_17, %c0_18], %22 {strides = array<i32>} : memref<8x128xf32, #tpu.memory_space<vmem>>, vector<8x128xf32>,
    return
  }
  func.func @transform_0(%arg0: i32) -> (i32, i32) {
    %c0_i32 = arith.constant 0 : i32
    %c0_i32_0 = arith.constant 0 : i32
    return %arg0, %c0_i32 : i32, i32
  }
  func.func @transform_1(%arg0: i32) -> (i32, i32) {
    %c0_i32 = arith.constant 0 : i32
    %c0_i32_0 = arith.constant 0 : i32
    %c0_i32_1 = arith.constant 0 : i32
    return %c0_i32, %c0_i32_0 : i32, i32
  }
  func.func @transform_2(%arg0: i32) -> (i32, i32) {
    %c0_i32 = arith.constant 0 : i32
    %c0_i32_0 = arith.constant 0 : i32
    %c0_i32_1 = arith.constant 0 : i32
    return %c0_i32, %c0_i32_0 : i32, i32
  }
  func.func @transform_3(%arg0: i32) -> (i32, i32) {
    %c0_i32 = arith.constant 0 : i32
    %c0_i32_0 = arith.constant 0 : i32
    %c0_i32_1 = arith.constant 0 : i32
    return %c0_i32, %c0_i32_0 : i32, i32
  }
  func.func @transform_4(%arg0: i32) -> (i32, i32) {
    %c0_i32 = arith.constant 0 : i32
    %c0_i32_0 = arith.constant 0 : i32
    %c0_i32_1 = arith.constant 0 : i32
    return %c0_i32, %c0_i32_0 : i32, i32
  }
  func.func @transform_5(%arg0: i32) -> (i32, i32) {
    %c0_i32 = arith.constant 0 : i32
    %c0_i32_0 = arith.constant 0 : i32
    %c0_i32_1 = arith.constant 0 : i32
    return %c0_i32, %c0_i32_0 : i32, i32
  }
  func.func @transform_6(%arg0: i32) -> (i32, i32) {
    %c0_i32 = arith.constant 0 : i32
    %c0_i32_0 = arith.constant 0 : i32
    %c0_i32_1 = arith.constant 0 : i32
    return %c0_i32, %c0_i32_0 : i32, i32
  }
  func.func @transform_7(%arg0: i32) -> (i32, i32) {
    %c0_i32 = arith.constant 0 : i32
    %c0_i32_0 = arith.constant 0 : i32
    return %arg0, %c0_i32 : i32, i32
  }
}

</mosaic_0001>

<bundles_post_ra>
// kernel: generator_forward.1
= control target key start
LH: loop header
LB: loop body
LE: loop exit
PB: predicated region body
PF: predicated region fallthrough
CT: control target
= control target key end

     0   :  { %v655_v1 = vmov 0.0   ;;  %vm656_vm0 = vmmov 0   ;;  %s834_s0 = inlined_call_operand.vmem [shape: bf16[8,128], index: 0, kind: input, shape index: {}]   ;;  %s835_s1 = inlined_call_operand.vmem [shape: bf16[128,128], index: 1, kind: input, shape index: {}]   ;;  %s836_s2 = inlined_call_operand.vmem [shape: f32[1,128], index: 2, kind: input, shape index: {}]   ;;  %s837_s3 = inlined_call_operand.vmem [shape: bf16[128,256], index: 3, kind: input, shape index: {}]   ;;  %s838_s4 = inlined_call_operand.vmem [shape: f32[1,256], index: 4, kind: input, shape index: {}]   ;;  %s839_s5 = inlined_call_operand.vmem [shape: bf16[256,128], index: 5, kind: input, shape index: {}]   ;;  %s840_s6 = inlined_call_operand.vmem [shape: f32[1,128], index: 6, kind: input, shape index: {}]   ;;  %s841_s7 = inlined_call_operand.hbm [shape: f32[8,128], index: 7, kind: output, shape index: {}]  }
   0x1   :  { %v583_v0 = vld [vmem:[%s835_s1 + $0x38] sm:$0xff]   ;;  %559 = vmatprep.subr.bf16.mxu0 %v655_v1  ;;  %v584_v2 = vld [vmem:[%s835_s1 + $0x30] sm:$0xff]   ;;  %575 = vmatprep.mubr.msk.bf16.mxu0 %vm656_vm0, %v655_v1  ;;  %v585_v3 = vld [vmem:[%s835_s1 + $0x28] sm:$0xff]  }
   0x2   :  { %560 = vmatpush3.bf16.msra.mxu0 %v583_v0  ;;  %v591_v4 = vld [vmem:[%s837_s3 + $0x74] ss:$8 sps:$4 sm:$0xff]   ;;  %v593_v5 = vld [vmem:[%s837_s3 + $0x70] ss:$8 sps:$4 sm:$0xff]   ;;  %v586_v6 = vld [vmem:[%s835_s1 + $0x20] sm:$0xff]  }
   0x3   :  { %561 = vmatprep.subr.bf16.mxu0 %v655_v1  ;;  %v594_v7 = vld [vmem:[%s837_s3 + $0x64] ss:$8 sps:$4 sm:$0xff]   ;;  %250 = vmatprep.subr.bf16.mxu1 %v591_v4  ;;  %v596_v8 = vld [vmem:[%s837_s3 + $0x60] ss:$8 sps:$4 sm:$0xff]   ;;  %v597_v9 = vld [vmem:[%s837_s3 + $0x54] ss:$8 sps:$4 sm:$0xff]  }
   0x4   :  { %251 = vmatpush1.bf16.msra.mxu1 %v593_v5  ;;  %v587_v10 = vld [vmem:[%s835_s1 + $0x18] sm:$0xff]   ;;  %v588_v12 = vld [vmem:[%s835_s1 + $0x10] sm:$0xff]   ;;  %v600_v13 = vld [vmem:[%s837_s3 + $0x44] ss:$8 sps:$4 sm:$0xff]  }
   0x5   :  { %252 = vmatprep.subr.bf16.mxu1 %v594_v7  ;;  %v599_v11 = vld [vmem:[%s837_s3 + $0x50] ss:$8 sps:$4 sm:$0xff]   ;;  %v602_v14 = vld [vmem:[%s837_s3 + $0x40] ss:$8 sps:$4 sm:$0xff]   ;;  %v603_v15 = vld [vmem:[%s837_s3 + $0x34] ss:$8 sps:$4 sm:$0xff]  }
   0x6   :  { %562 = vmatpush3.bf16.msra.mxu0 %v584_v2  ;;  %v589_v16 = vld [vmem:[%s835_s1 + $0x8] sm:$0xff]   ;;  %v605_v17 = vld [vmem:[%s837_s3 + $0x30] ss:$8 sps:$4 sm:$0xff]   ;;  %v590_v19 = vld [vmem:[%s835_s1] sm:$0xff]  }
   0x7   :  { %563 = vmatprep.subr.bf16.mxu0 %v655_v1  ;;  %v606_v18 = vld [vmem:[%s837_s3 + $0x24] ss:$8 sps:$4 sm:$0xff]   ;;  %v608_v20 = vld [vmem:[%s837_s3 + $0x20] ss:$8 sps:$4 sm:$0xff]   ;;  %v609_v21 = vld [vmem:[%s837_s3 + $0x14] ss:$8 sps:$4 sm:$0xff]  }
   0x8   :  { %253 = vmatpush1.bf16.msra.mxu1 %v596_v8 }
   0x9   :  { %254 = vmatprep.subr.bf16.mxu1 %v597_v9 }
   0xa   :  { %564 = vmatpush3.bf16.msra.mxu0 %v585_v3 }
   0xb   :  { %565 = vmatprep.subr.bf16.mxu0 %v655_v1 }
   0xc   :  { %255 = vmatpush1.bf16.msra.mxu1 %v599_v11 }
   0xd   :  { %256 = vmatprep.subr.bf16.mxu1 %v600_v13 }
   0xe   :  { %566 = vmatpush3.bf16.msra.mxu0 %v586_v6 }
   0xf   :  { %567 = vmatprep.subr.bf16.mxu0 %v655_v1 }
  0x10   :  { %257 = vmatpush1.bf16.msra.mxu1 %v602_v14 }
  0x11   :  { %258 = vmatprep.subr.bf16.mxu1 %v603_v15 }
  0x12   :  { %568 = vmatpush3.bf16.msra.mxu0 %v587_v10 }
  0x13   :  { %569 = vmatprep.subr.bf16.mxu0 %v655_v1 }
  0x14   :  { %259 = vmatpush1.bf16.msra.mxu1 %v605_v17 }
  0x15   :  { %260 = vmatprep.subr.bf16.mxu1 %v606_v18 }
  0x16   :  { %570 = vmatpush3.bf16.msra.mxu0 %v588_v12 }
  0x17   :  { %571 = vmatprep.subr.bf16.mxu0 %v655_v1 }
  0x1a   :  { %572 = vmatpush3.bf16.msra.mxu0 %v589_v16 }
  0x1b   :  { %573 = vmatprep.subr.bf16.mxu0 %v655_v1 }
  0x1c   :  { %12 = vsyncpa [#allocation3], 0  ;;  %v28_v22 = vld [vmem:[%s834_s0] sm:$0xf]  ;;  %261 = vmatpush1.bf16.msra.mxu1 %v608_v20  ;;  %v611_v23 = vld [vmem:[%s837_s3 + $0x10] ss:$8 sps:$4 sm:$0xff]   ;;  %v160_v51 = vlaneseq }
  0x1d   :  { %262 = vmatprep.subr.bf16.mxu1 %v609_v21  ;;  %v612_v24 = vld [vmem:[%s837_s3 + $0x4] ss:$8 sps:$4 sm:$0xff]   ;;  %v614_v25 = vld [vmem:[%s837_s3] ss:$8 sps:$4 sm:$0xff]   ;;  %v657_v26 = vmov 0   ;;  %v615_v27 = vld [vmem:[%s839_s5 + $0x78] sm:$0xff]  }
  0x1e   :  { %574 = vmatpush3.bf16.msra.mxu0 %v590_v19  ;;  %282 = vmatprep.mubr.bf16.mxu1 %v657_v26  ;;  %v616_v28 = vld [vmem:[%s839_s5 + $0x38] sm:$0xff]   ;;  %v617_v29 = vld [vmem:[%s839_s5 + $0x70] sm:$0xff]   ;;  %v619_v31 = vld [vmem:[%s839_s5 + $0x68] sm:$0xff]   ;;  %v161_v52 = vshrl.u32 %v160_v51, 7 }
  0x1f   :  { %537 = vmatprep.subr.bf16.mxu0 %v615_v27  ;;  %v618_v30 = vld [vmem:[%s839_s5 + $0x30] sm:$0xff]   ;;  %v620_v32 = vld [vmem:[%s839_s5 + $0x28] sm:$0xff]   ;;  %v621_v33 = vld [vmem:[%s839_s5 + $0x60] sm:$0xff]  }
  0x20   :  { %263 = vmatpush1.bf16.msra.mxu1 %v611_v23  ;;  %v622_v34 = vld [vmem:[%s839_s5 + $0x20] sm:$0xff]   ;;  %v623_v35 = vld [vmem:[%s839_s5 + $0x58] sm:$0xff]   ;;  %v625_v37 = vld [vmem:[%s839_s5 + $0x50] sm:$0xff]   ;;  %v162_v53 = vsub.s32 0, %v161_v52  ;;  %v166_v55 = vsub.s32 1, %v161_v52 }
  0x21   :  { %576 = vmatmul.mubr.bf16.vlgmr.msra.gmra.mxu0 %v28_v22  ;;  %264 = vmatprep.subr.bf16.mxu1 %v612_v24  ;;  %v624_v36 = vld [vmem:[%s839_s5 + $0x18] sm:$0xff]   ;;  %v626_v38 = vld [vmem:[%s839_s5 + $0x10] sm:$0xff]   ;;  %v486_v39 = vld [vmem:[%s836_s2] ss:$0 sm:$0xff] }
  0x22   :  { %538 = vmatpush3.bf16.msra.mxu0 %v616_v28  ;;  %v627_v47 = vld [vmem:[%s839_s5 + $0x48] sm:$0xff]   ;;  %v629_v49 = vld [vmem:[%s839_s5 + $0x40] sm:$0xff]  }
  0x23   :  { %539 = vmatprep.subr.bf16.mxu0 %v617_v29  ;;  %v628_v48 = vld [vmem:[%s839_s5 + $0x8] sm:$0xff]   ;;  %v630_v50 = vld [vmem:[%s839_s5] sm:$0xff]  }
  0x24   :  { %265 = vmatpush1.bf16.msra.mxu1 %v614_v25  ;;  %v158_v54 = vld [vmem:[%s838_s4] sm:$0x3]  ;;  %s658_s4 = smov [#allocation2]  }
  0x25   :  { %v163_v56 = vrot.slane %v158_v54, %v162_v53  ;;  %v167_v57 = vrot.slane %v158_v54, %v166_v55  ;;  %v511_v5 = vld [vmem:[%s840_s6] ss:$0 sm:$0xff]  ;;  %s478_s12 = sshll.u32 %s658_s4, 4  ;;  %s479_s12 = int_to_ptr.vmem [resolvable:$true] %s478_s12 }
  0x26   :  { %540 = vmatpush3.bf16.msra.mxu0 %v618_v30  ;;  %s633_s13 = scalar_lea.vmem %s479_s12, 128  ;;  %p638_p1 = scmp.lt.s32.totalorder %s479_s12, %s479_s12 }
  0x27   :  { %541 = vmatprep.subr.bf16.mxu0 %v619_v31  ;;  %p634_p0 = scmp.ne.s32.totalorder %s479_s12, %s633_s13  ;;  %p639_p2 = scmp.lt.s32.totalorder %s633_s13, %s633_s13 }
  0x29   :  { %p640_p3 = por %p639_p2, %p638_p1 }
  0x2a   :  { %542 = vmatpush3.bf16.msra.mxu0 %v620_v32 }
  0x2b   :  { %543 = vmatprep.subr.bf16.mxu0 %v621_v33  ;;  %p641_p4 = pnand %p640_p3, %p634_p0 }
  0x2e   :  { %544 = vmatpush3.bf16.msra.mxu0 %v622_v34 }
  0x2f   :  { %545 = vmatprep.subr.bf16.mxu0 %v623_v35 }
  0x32   :  { %546 = vmatpush3.bf16.msra.mxu0 %v624_v36 }
  0x33   :  { %547 = vmatprep.subr.bf16.mxu0 %v625_v37 }
  0x36   :  { %548 = vmatpush3.bf16.msra.mxu0 %v626_v38 }
  0x37   :  { %549 = vmatprep.subr.bf16.mxu0 %v627_v47 }
  0x3a   :  { %550 = vmatpush3.bf16.msra.mxu0 %v628_v48 }
  0x3b   :  { %551 = vmatprep.subr.bf16.mxu0 %v629_v49 }
  0x3e   :  { %552 = vmatpush3.bf16.msra.mxu0 %v630_v50 }
  0xe1   :  { %v134_v40 = vpop.f32.mrf.mxu0 }
  0xe2   :  { %v135_v41 = vadd.f32 %v486_v39, %v134_v40 }
  0xe3   :  { %v577_v42 = vpop.f32.mrf.mxu0 }
  0xe4   :  { %v140_v43 = vmax.f32 %v135_v41, 0.0 }
  0xe5   :  { %v137_v44 = vpop.f32.mrf.mxu0 }
  0xe6   :  { %v141_v45 = vpack.c.bf16 %v140_v43, %v140_v43 }
  0xe7   :  { %v578_v46 = vpop.f32.mrf.mxu0 }
  0xe8   :  { %283 = vmatmul.mubr.bf16.vlgmr.msra.gmra.mxu1 %v141_v45 }
 0x1a8   :  { %v284_v58 = vpop.f32.mrf.mxu1 }
 0x1a9   :  { %v285_v59 = vadd.f32 %v284_v58, %v163_v56 }
 0x1aa   :  { %v286_v60 = vpop.f32.mrf.mxu1 }
 0x1ab   :  { %v287_v61 = vadd.f32 %v286_v60, %v167_v57  ;;  %v291_v62 = vmax.f32 %v285_v59, 0.0 }
 0x1ac   :  { %v288_v63 = vpop.f32.mrf.mxu1 }
 0x1ad   :  { %v292_v0 = vmax.f32 %v287_v61, 0.0  ;;  %v293_v3 = vpack.c.bf16 %v291_v62, %v291_v62 }
 0x1ae   :  { %v289_v1 = vpop.f32.mrf.mxu1 }
 0x1af   :  { %v294_v2 = vpack.c.bf16 %v292_v0, %v292_v0 }
 0x1b1   :  { %462 = vmatprep.mubr.bf16.mxu0 %v294_v2 }
 0x1b2   :  { %463 = vmatmul.mubr.bf16.vlgmr.msra.gmra.mxu0 %v293_v3 }
 0x272   :  { %v553_v4 = vpop.f32.mrf.mxu0 }
 0x274   :  { %v554_v6 = vpop.f32.mrf.mxu0 }
 0x275   :  { %v555_v7 = vadd.f32 %v554_v6, %v553_v4 }
 0x276   :  { %v556_v8 = vpop.f32.mrf.mxu0 }
 0x277   :  { %v465_v9 = vadd.f32 %v555_v7, %v511_v5 }
 0x278   :  { %v557_v10 = vpop.f32.mrf.mxu0 }
 0x279   :  { %631 = vtanh.f32 %v465_v9 }
 0x286   :  { %v632_v11 = vpop.eup %631 }
 0x287   :  { %471 = vst [vmem:[#allocation2] sm:$0xff] %v632_v11 }
 0x288   :  { %644 = shalt.err (!%p641_p4)
}
 0x289   :  { %481 = dma.vmem_to_hbm [thread:$0]  %s479_s12, 128, %s841_s7, [#allocation3]  }
 0x28a   :  { %653 = dma.done.wait [#allocation3], 128  }
 0x28b   :  { %654 = vsyncadd [#allocation3], 4294967168 }
 0x28c   :  { %485 = vsyncpa [#allocation3], 1 }

</bundles_post_ra>
